<compile_context>
chip_gen: v5e
topology: v5e:2x2
jax: 0.10.0
libtpu: 0.0.40
codegen_flags: <defaults>
</compile_context>

<pallas_src>
import functools

import jax
import jax.numpy as jnp
from jax.experimental import pallas as pl
from jax.experimental.pallas import tpu as pltpu


def _ce_loss_kernel(logits_ref, labels_ref, partial_ref, *, n_true, tm):
    """Masked partial sum of per-row cross-entropy for one (TM, C) row tile.

    logits_ref:  VMEM (TM, C) in the input dtype (bf16/f32/...)
    labels_ref:  VMEM (TM, 1) int32
    partial_ref: SMEM (1, 1) float32 — this tile's partial sum
    """
    i = pl.program_id(0)

    logits = logits_ref[...]                                      # (TM, C) input dtype
    labels = labels_ref[...]                                      # (TM, 1) i32

    # Numerically stable log-sum-exp. Row max is taken in the input dtype
    # (exact for max); only the (TM, 1) result is upcast so the full-tile f32
    # upcast fuses into the subtract instead of materializing a copy.
    row_max = jnp.max(logits, axis=-1, keepdims=True).astype(jnp.float32)
    shifted = logits.astype(jnp.float32) - row_max                 # (TM, C) f32
    sum_exp = jnp.sum(jnp.exp(shifted), axis=-1, keepdims=True)    # (TM, 1)

    # Gather the label logit from `shifted` so the row_max terms cancel
    # algebraically (one fewer live (TM, C) tensor).
    col_idx = jax.lax.broadcasted_iota(jnp.int32, shifted.shape, 1)
    label_shifted = jnp.sum(
        jnp.where(col_idx == labels, shifted, 0.0),
        axis=-1, keepdims=True)                                    # (TM, 1)

    per_example = jnp.log(sum_exp) - label_shifted                 # (TM, 1)

    # Mask rows beyond the true batch size. The ragged last block may contain
    # arbitrary (even non-finite) data, so this select MUST stay ahead of the
    # cross-row sum below.
    row_idx = jax.lax.broadcasted_iota(jnp.int32, (tm, 1), 0) + i * tm
    per_example = jnp.where(row_idx < n_true, per_example, 0.0)

    partial_ref[0, 0] = jnp.sum(per_example)


def _vmem_capacity_bytes():
    try:
        return int(pltpu.get_tpu_info().vmem_capacity_bytes)
    except Exception:
        return 64 * 1024 * 1024  # conservative (v7x-sized) fallback


def _pick_row_tile(n, c, itemsize):
    """Rows per grid step + vmem limit, sized per generation.

    Footprint model per grid step:
      2 * TM * C * itemsize      (double-buffered input tile)
    + 3 * TM * C * 4             (f32 intermediates: shifted, exp, iota/cmp)
    """
    vmem_cap = _vmem_capacity_bytes()
    if vmem_cap >= 100 * 1024 * 1024:          # v5e / v6e: 128 MiB physical
        tile_budget = 40 * 1024 * 1024
        vmem_limit = 64 * 1024 * 1024
    else:                                      # v7x: 64 MiB physical per TC
        tile_budget = 24 * 1024 * 1024
        vmem_limit = 48 * 1024 * 1024

    bytes_per_row = c * (2 * itemsize + 3 * 4)
    max_tm = max(tile_budget // bytes_per_row, 8)
    align = 16 if itemsize < 4 else 8          # bf16 packs 16 sublanes/vreg
    tm = min(1024, max_tm)
    tm = max((tm // align) * align, align)

    # Don't pad far past the real batch for small inputs.
    n_rounded = ((n + align - 1) // align) * align
    tm = min(tm, n_rounded)

    # Keep >= 2 grid steps whenever N allows it so v7x's second TensorCore
    # gets work under dimension_semantics=("parallel",). No-op on v5e/v6e.
    if n_rounded > align and tm >= n_rounded:
        half = -(-n // 2)
        tm = max(((half + align - 1) // align) * align, align)
        tm = min(tm, n_rounded)

    return tm, vmem_limit


@functools.partial(jax.jit, static_argnames=("temperature",))
def ce_loss(pros, label, temperature=2.0):
    """Equivalent of CELoss(temperature).forward(pros, label).

    Note: the PyTorch module never uses `temperature` in forward(); it is
    accepted and ignored here for interface parity.
    Note: labels are assumed in [0, C) (no ignore_index handling), matching
    the default usage in the reference module.
    """
    del temperature  # unused by the PyTorch module's forward
    n, c = pros.shape
    itemsize = jnp.dtype(pros.dtype).itemsize
    tm, vmem_limit = _pick_row_tile(n, c, itemsize)
    num_tiles = -(-n // tm)          # cdiv; last block may be ragged (masked)

    labels2d = label.astype(jnp.int32).reshape(n, 1)

    kernel = functools.partial(_ce_loss_kernel, n_true=n, tm=tm)

    cost = pl.CostEstimate(
        flops=int(5 * n * c),
        transcendentals=int(n * c),
        bytes_accessed=int(n * c * itemsize + n * 4 + num_tiles * 4),
    )

    partials = pl.pallas_call(
        kernel,
        out_shape=jax.ShapeDtypeStruct((num_tiles, 1), jnp.float32),
        grid=(num_tiles,),
        in_specs=[
            pl.BlockSpec((tm, c), lambda i: (i, 0)),     # logits row tile, HBM dtype
            pl.BlockSpec((tm, 1), lambda i: (i, 0)),     # labels row tile
        ],
        out_specs=pl.BlockSpec((1, 1), lambda i: (i, 0),
                               memory_space=pltpu.MemorySpace.SMEM),
        compiler_params=pltpu.CompilerParams(
            dimension_semantics=("parallel",),
            vmem_limit_bytes=vmem_limit),
        cost_estimate=cost,
    )(pros, labels2d)

    return jnp.sum(partials) / jnp.float32(n)


def _reference_ce(pros, label):
    """Pure-JAX reference (PyTorch CrossEntropyLoss semantics, mean)."""
    logp = jax.nn.log_softmax(pros.astype(jnp.float32), axis=-1)
    picked = jnp.take_along_axis(logp, label[:, None].astype(jnp.int32), axis=-1)
    return -jnp.mean(picked)


if __name__ == "__main__":
    key = jax.random.PRNGKey(0)
    k1, k2, k3, k4 = jax.random.split(key, 4)

    # Case 1: small f32 batch, exact tile fit (N=8, C=32).
    N1, C1 = 8, 32
    pros1 = jax.random.normal(k1, (N1, C1), dtype=jnp.float32)
    label1 = jax.random.randint(k2, (N1,), 0, C1, dtype=jnp.int32)
    loss1 = ce_loss(pros1, label1, temperature=2.0)
    jax.block_until_ready(loss1)
    ref1 = _reference_ce(pros1, label1)
    assert jnp.allclose(loss1, ref1, rtol=1e-5, atol=1e-5), (loss1, ref1)

    # Case 2: bf16 logits, N not a multiple of the row tile — exercises the
    # unpadded ragged-last-block path, in-kernel masking, and the >=2-tile
    # split for megacore.
    N2, C2 = 37, 160
    pros2 = jax.random.normal(k3, (N2, C2), dtype=jnp.bfloat16)
    label2 = jax.random.randint(k4, (N2,), 0, C2, dtype=jnp.int32)
    loss2 = ce_loss(pros2, label2, temperature=2.0)
    jax.block_until_ready(loss2)
    ref2 = _reference_ce(pros2, label2)
    assert jnp.allclose(loss2, ref2, rtol=1e-4, atol=1e-4), (loss2, ref2)

    print("KERNEL_OK")
</pallas_src>

<mosaic_0001>
module attributes {stable_mosaic.version = 11 : i64} {
  func.func @_ce_loss_kernel(%arg0: i32, %arg1: memref<8x32xf32, #tpu.memory_space<vmem>>, %arg2: memref<8x1xi32, #tpu.memory_space<vmem>>, %arg3: memref<1x1xf32, #tpu.memory_space<smem>>) attributes {dimension_semantics = [#tpu.dimension_semantics<parallel>], iteration_bounds = array<i64: 1>, scalar_prefetch = 0 : i64, scratch_operands = 0 : i64, tpu.core_type = #tpu.core_type<tc>, window_params = [{transform_indices = @transform_0, window_bounds = array<i64: 8, 32>}, {transform_indices = @transform_1, window_bounds = array<i64: 8, 1>}, {transform_indices = @transform_2, window_bounds = array<i64: 1, 1>}]} {
    %c0 = arith.constant 0 : index
    %c0_0 = arith.constant 0 : index
    %0 = vector.load %arg1[%c0, %c0_0] : memref<8x32xf32, #tpu.memory_space<vmem>>, vector<8x32xf32>
    %c0_1 = arith.constant 0 : index
    %c0_2 = arith.constant 0 : index
    %1 = vector.load %arg2[%c0_1, %c0_2] : memref<8x1xi32, #tpu.memory_space<vmem>>, vector<8x1xi32>
    %cst = arith.constant dense<0xFF800000> : vector<8xf32>
    %2 = vector.multi_reduction <maximumf>, %0, %cst [1] : vector<8x32xf32> to vector<8xf32>
    %3 = vector.shape_cast %2 : vector<8xf32> to vector<8x1xf32>
    %4 = vector.broadcast %3 : vector<8x1xf32> to vector<8x32xf32>
    %5 = arith.subf %0, %4 : vector<8x32xf32>
    %6 = math.exp %5 : vector<8x32xf32>
    %cst_3 = arith.constant dense<0.000000e+00> : vector<8xf32>
    %7 = vector.multi_reduction <add>, %6, %cst_3 [1] : vector<8x32xf32> to vector<8xf32>
    %8 = vector.shape_cast %7 : vector<8xf32> to vector<8x1xf32>
    %9 = tpu.iota {dimensions = array<i32: 1>} : vector<8x32xi32>
    %10 = vector.broadcast %1 : vector<8x1xi32> to vector<8x32xi32>
    %11 = arith.cmpi eq, %9, %10 : vector<8x32xi32>
    %cst_4 = arith.constant 0.000000e+00 : f32
    %12 = vector.broadcast %cst_4 : f32 to vector<8x32xf32>
    %13 = arith.select %11, %5, %12 : vector<8x32xi1>, vector<8x32xf32>
    %cst_5 = arith.constant dense<0.000000e+00> : vector<8xf32>
    %14 = vector.multi_reduction <add>, %13, %cst_5 [1] : vector<8x32xf32> to vector<8xf32>
    %15 = vector.shape_cast %14 : vector<8xf32> to vector<8x1xf32>
    %16 = math.log %8 : vector<8x1xf32>
    %17 = arith.subf %16, %15 : vector<8x1xf32>
    %18 = tpu.iota {dimensions = array<i32: 0>} : vector<8x1xi32>
    %c8_i32 = arith.constant 8 : i32
    %19 = arith.muli %arg0, %c8_i32 : i32
    %20 = vector.broadcast %19 : i32 to vector<8x1xi32>
    %21 = arith.addi %18, %20 : vector<8x1xi32>
    %c8_i32_6 = arith.constant 8 : i32
    %22 = vector.broadcast %c8_i32_6 : i32 to vector<8x1xi32>
    %23 = arith.cmpi slt, %21, %22 : vector<8x1xi32>
    %cst_7 = arith.constant 0.000000e+00 : f32
    %24 = vector.broadcast %cst_7 : f32 to vector<8x1xf32>
    %25 = arith.select %23, %17, %24 : vector<8x1xi1>, vector<8x1xf32>
    %26 = vector.shape_cast %25 : vector<8x1xf32> to vector<1x8x1xf32>
    %cst_8 = arith.constant dense<0.000000e+00> : vector<1xf32>
    %27 = vector.multi_reduction <add>, %26, %cst_8 [1, 2] : vector<1x8x1xf32> to vector<1xf32>
    %28 = vector.shape_cast %27 : vector<1xf32> to vector<1x1x1xf32>
    %29 = vector.extract %28[0, 0, 0] : f32 from vector<1x1x1xf32>
    %c0_9 = arith.constant 0 : index
    %c0_10 = arith.constant 0 : index
    %30 = memref.load %arg3[%c0_9, %c0_10] : memref<1x1xf32, #tpu.memory_space<smem>>
    memref.store %29, %arg3[%c0_9, %c0_10] : memref<1x1xf32, #tpu.memory_space<smem>>
    return
  }
  func.func @transform_0(%arg0: i32) -> (i32, i32) {
    %c0_i32 = arith.constant 0 : i32
    %c0_i32_0 = arith.constant 0 : i32
    return %arg0, %c0_i32 : i32, i32
  }
  func.func @transform_1(%arg0: i32) -> (i32, i32) {
    %c0_i32 = arith.constant 0 : i32
    %c0_i32_0 = arith.constant 0 : i32
    return %arg0, %c0_i32 : i32, i32
  }
  func.func @transform_2(%arg0: i32) -> (i32, i32) {
    %c0_i32 = arith.constant 0 : i32
    %c0_i32_0 = arith.constant 0 : i32
    return %arg0, %c0_i32 : i32, i32
  }
}

</mosaic_0001>

<bundles_post_ra>
// kernel: ce_loss.1
= control target key start
LH: loop header
LB: loop body
LE: loop exit
PB: predicated region body
PF: predicated region fallthrough
CT: control target
= control target key end

     0   :  { %vm14_vm0 = vcmask 261120   ;;  %s124_s0 = inlined_call_operand.vmem [shape: f32[8,32], index: 0, kind: input, shape index: {}]   ;;  %s125_s1 = inlined_call_operand.vmem [shape: s32[8,1], index: 1, kind: input, shape index: {}]   ;;  %s126_s2 = inlined_call_operand.hbm [shape: f32[1,1], index: 2, kind: output, shape index: {}]  }
   0x1   :  { %v12_v0 = vld [vmem:[%s124_s0] sm:$0xff] }
   0x2   :  { %7 = vsyncpa [#allocation3], 0  ;;  %v15_v1 = vsel %vm14_vm0, %v12_v0, -inf  ;;  %v95_v2 = vmov 0   ;;  %v13_v3 = vld [vmem:[%s125_s1] sm:$0xff]  ;;  %v24_v9 = vlaneseq  ;;  %vm44_vm2 = vcmask 7168  }
   0x3   :  { %76 = vset.pattern.permute.xlu0 %v95_v2  ;;  %s62_s13 = sshll.u32 %s126_s2, 4  ;;  %s96_s15 = smov [#allocation2]   ;;  %s63_s13 = int_to_ptr.hbm [resolvable:$true] %s62_s13 }
   0x4   :  { %16 = vmax.xlane.f32.xlu0 %v15_v1  ;;  %v25_v10 = vand.u32 127, %v24_v9 }
  0x18   :  { %27 = vperm.xlu0 %76, %v13_v3  }
  0x77   :  { %v17_v4 = vpop.xlane.xlu0 %16 }
  0x78   :  { %v18_v5 = vsub.f32 %v12_v0, %v17_v4 }
  0x7a   :  { %v19_v6 = vmul.f32 1.442695, %v18_v5 }
  0x7c   :  { %77 = vpow2.f32 %v19_v6 }
  0x82   :  { %v78_v7 = vpop.eup %77 }
  0x83   :  { %v21_v8 = vsel %vm14_vm0, %v78_v7, 0.0 }
  0x84   :  { %22 = vadd.xlane.f32.xlu1 %v21_v8 }
  0x8a   :  { %v28_v11 = vpop.permute.xlu0 %27 }
  0x8b   :  { %vm29_vm1 = vcmp.eq.s32.totalorder %v25_v10, %v28_v11 }
  0x8c   :  { %v30_v12 = vsel %vm29_vm1, %v18_v5, 0.0 }
  0x8d   :  { %v31_v13 = vsel %vm14_vm0, %v30_v12, 0.0 }
  0x8e   :  { %32 = vadd.xlane.f32.xlu1 %v31_v13 }
  0xf7   :  { %v23_v14 = vpop.xlane.xlu1 %22 }
  0xf8   :  { %79 = vlog2.f32 %v23_v14 }
  0xfe   :  { %v80_v15 = vpop.eup %79 }
  0xff   :  { %v35_v16 = vmul.f32 0.6931472, %v80_v15 }
 0x101   :  { %v33_v17 = vpop.xlane.xlu1 %32 }
 0x102   :  { %v36_v18 = vsub.f32 %v35_v16, %v33_v17 }
 0x104   :  { %v45_v19 = vsel %vm44_vm2, %v36_v18, 0.0 }
 0x105   :  { %46 = vadd.xlane.f32.xlu2 %v45_v19 }
 0x178   :  { %v47_v20 = vpop.xlane.xlu2 %46 }
 0x179   :  { %v48_v21 = vrot.slane %v47_v20, 4 }
 0x17b   :  { %v49_v22 = vadd.f32 %v48_v21, %v47_v20 }
 0x17d   :  { %v50_v23 = vrot.slane %v49_v22, 2 }
 0x17f   :  { %v51_v24 = vadd.f32 %v50_v23, %v49_v22 }
 0x181   :  { %v52_v25 = vrot.slane %v51_v24, 1 }
 0x183   :  { %v53_v26 = vadd.f32 %v52_v25, %v51_v24 }
 0x185   :  { %72 = vpush %v53_v26 }
 0x1b6   :  { %s73_s14 = spop %72 }
 0x1b7   :  { %56 = sst [smem:[#allocation2]] %s73_s14 }
 0x1b8   :  { %65 = dma.smem_to_hbm %s96_s15, 16, %s63_s13, [#allocation3]  }
 0x1b9   :  { %93 = dma.done.wait [#allocation3], 16  }
 0x1ba   :  { %94 = vsyncadd [#allocation3], 4294967280 }
 0x1bb   :  { %70 = sfence }
 0x1bc   :  { %71 = vsyncpa [#allocation3], 1 }

</bundles_post_ra>
